<compile_context>
chip_gen: v7x
topology: tpu7x:2x2x1
jax: 0.10.0
libtpu: 0.0.40
codegen_flags: <defaults>
</compile_context>

<pallas_src>
import functools

import jax
import jax.numpy as jnp
from jax.experimental import pallas as pl
from jax.experimental.pallas import tpu as pltpu


def frn_kernel(eps_ref, params_ref, x_ref, o_ref, *, inv_hw):
    # eps_ref:   (1,)  float32 in SMEM
    # params_ref:(3, block_rows, 1) float32  -> gamma / beta / tau rows
    # x_ref/o_ref: (block_rows, hw_padded)
    x = x_ref[...].astype(jnp.float32)
    # Sum of squares over the (zero-padded) lane axis, divided by the TRUE H*W,
    # so lane padding does not change the statistics.
    nu2 = jnp.sum(x * x, axis=-1, keepdims=True) * inv_hw        # (block_rows, 1)
    eps = jnp.abs(eps_ref[0])
    scale = jax.lax.rsqrt(nu2 + eps)
    g = params_ref[0]                                            # (block_rows, 1)
    b = params_ref[1]
    t = params_ref[2]
    y = jnp.maximum(g * (x * scale) + b, t)
    o_ref[...] = y.astype(o_ref.dtype)


def _round_up(x, m):
    return -(-x // m) * m


def _vmem_capacity_bytes():
    try:
        cap = int(getattr(pltpu.get_tpu_info(), "vmem_capacity_bytes"))
        if cap > 0:
            return cap
    except Exception:
        pass
    # Conservative default that is legal on every generation (v7x per-TC VMEM).
    return 64 * 1024 * 1024


def filter_response_norm(x, gamma, beta, tau, eps):
    """x: (N, C, H, W). gamma/beta/tau: (1, C, 1, 1). eps: scalar array, e.g. (1,)."""
    n, c, h, w = x.shape
    assert gamma.shape[1] == c and beta.shape[1] == c and tau.shape[1] == c

    rows = n * c
    hw = h * w
    hw_p = _round_up(hw, 128)                       # lane-dense last dim
    dtype_bytes = jnp.dtype(x.dtype).itemsize
    # Sublane packing: bf16 likes 16-row alignment, int8/fp8 32-row.
    row_align = 8 if dtype_bytes >= 4 else (16 if dtype_bytes == 2 else 32)

    # ---- pick a row block that fills (but does not bust) this chip's VMEM ----
    vmem_cap = _vmem_capacity_bytes()
    buffer_budget = vmem_cap // 4                   # in+out double-buffered blocks
    # per row: (in + out) x 2 pipeline buffers in x.dtype, plus ~2x f32 working set
    per_row = hw_p * (4 * dtype_bytes + 2 * 4)
    max_rows = max(row_align, (buffer_budget // per_row) // row_align * row_align)
    # TODO(synk): for extremely large H*W (one row-block no longer fits VMEM),
    # add a trailing "arbitrary" hw-block axis with a two-pass sum(x^2) scratch.

    rows_a = _round_up(rows, row_align)
    num_blocks = max(1, pl.cdiv(rows_a, max_rows))
    # Keep >= 2 grid steps when there is enough work (v7x: 2 TensorCores/chip).
    if num_blocks == 1 and rows_a >= 2 * row_align:
        num_blocks = 2
    block_rows = _round_up(pl.cdiv(rows_a, num_blocks), row_align)
    rows_p = _round_up(rows, block_rows)
    grid = (rows_p // block_rows,)

    # ---- build kernel inputs -------------------------------------------------
    x2 = x.reshape(rows, hw)
    if (rows_p, hw_p) != (rows, hw):
        x2 = jnp.pad(x2, ((0, rows_p - rows), (0, hw_p - hw)))

    # Fused per-row parameters: (3, rows_p, 1) = [gamma; beta; tau].
    params_c = jnp.stack(
        [gamma.reshape(c), beta.reshape(c), tau.reshape(c)], axis=0
    ).astype(jnp.float32)                                        # (3, C)
    params = jnp.broadcast_to(params_c[:, None, :], (3, n, c)).reshape(3, rows)
    if rows_p != rows:
        params = jnp.pad(params, ((0, 0), (0, rows_p - rows)))
    params = params[:, :, None]                                  # (3, rows_p, 1)

    eps1 = jnp.asarray(eps, jnp.float32).reshape(1)              # (1,) SMEM scalar

    out = pl.pallas_call(
        functools.partial(frn_kernel, inv_hw=1.0 / float(hw)),
        out_shape=jax.ShapeDtypeStruct((rows_p, hw_p), x.dtype),
        grid_spec=pl.GridSpec(
            grid=grid,
            in_specs=[
                pl.BlockSpec(memory_space=pltpu.MemorySpace.SMEM),      # eps
                pl.BlockSpec((3, block_rows, 1), lambda i: (0, i, 0)),  # gamma/beta/tau
                pl.BlockSpec((block_rows, hw_p), lambda i: (i, 0)),     # x
            ],
            out_specs=pl.BlockSpec((block_rows, hw_p), lambda i: (i, 0)),
        ),
        compiler_params=pltpu.CompilerParams(
            dimension_semantics=("parallel",),
            vmem_limit_bytes=int(min(vmem_cap * 3 // 4, 128 * 1024 * 1024)),
        ),
    )(eps1, params, x2)

    if (rows_p, hw_p) != (rows, hw):
        out = out[:rows, :hw]
    return out.reshape(n, c, h, w)


def frn_reference(x, gamma, beta, tau, eps):
    xf = x.astype(jnp.float32)
    nu2 = jnp.mean(jnp.square(xf), axis=(2, 3), keepdims=True)
    xn = xf * jax.lax.rsqrt(nu2 + jnp.abs(eps))
    return jnp.maximum(gamma * xn + beta, tau).astype(x.dtype)


if __name__ == "__main__":
    key = jax.random.PRNGKey(0)

    # --- case 1: module default init (gamma=1, beta=0, tau=0), aligned shape ---
    N, C, H, W = 2, 4, 16, 16
    k1, k2, k3, k4, k5 = jax.random.split(key, 5)
    x = jax.random.normal(k1, (N, C, H, W), dtype=jnp.float32)
    gamma = jnp.ones((1, C, 1, 1), jnp.float32)
    beta = jnp.zeros((1, C, 1, 1), jnp.float32)
    tau = jnp.zeros((1, C, 1, 1), jnp.float32)
    eps = jnp.array([1e-6], jnp.float32)

    out = jax.block_until_ready(filter_response_norm(x, gamma, beta, tau, eps))
    ref = frn_reference(x, gamma, beta, tau, eps)
    assert out.shape == (N, C, H, W)
    assert jnp.allclose(out, ref, atol=1e-5, rtol=1e-5), "mismatch vs reference (case 1)"

    # --- case 2: ragged shape (exercises row/lane padding) + random params ---
    N2, C2, H2, W2 = 3, 5, 7, 9
    x2 = jax.random.normal(k2, (N2, C2, H2, W2), dtype=jnp.float32)
    gamma2 = jax.random.normal(k3, (1, C2, 1, 1), jnp.float32)
    beta2 = jax.random.normal(k4, (1, C2, 1, 1), jnp.float32)
    tau2 = jax.random.normal(k5, (1, C2, 1, 1), jnp.float32)

    out2 = jax.block_until_ready(filter_response_norm(x2, gamma2, beta2, tau2, eps))
    ref2 = frn_reference(x2, gamma2, beta2, tau2, eps)
    assert out2.shape == (N2, C2, H2, W2)
    assert jnp.allclose(out2, ref2, atol=1e-5, rtol=1e-5), "mismatch vs reference (case 2)"

    print("KERNEL_OK")
</pallas_src>

<mosaic_0001>
module attributes {stable_mosaic.version = 11 : i64} {
  func.func @frn_kernel(%arg0: i32, %arg1: memref<1xf32, #tpu.memory_space<smem>>, %arg2: memref<3x8x1xf32, #tpu.memory_space<vmem>>, %arg3: memref<8x256xf32, #tpu.memory_space<vmem>>, %arg4: memref<8x256xf32, #tpu.memory_space<vmem>>) attributes {dimension_semantics = [#tpu.dimension_semantics<parallel>], iteration_bounds = array<i64: 1>, scalar_prefetch = 0 : i64, scratch_operands = 0 : i64, tpu.core_type = #tpu.core_type<tc>, window_params = [{transform_indices = @transform_0, window_bounds = array<i64: 1>}, {transform_indices = @transform_1, window_bounds = array<i64: 3, 8, 1>}, {transform_indices = @transform_2, window_bounds = array<i64: 8, 256>}, {transform_indices = @transform_3, window_bounds = array<i64: 8, 256>}]} {
    %c0 = arith.constant 0 : index
    %c0_0 = arith.constant 0 : index
    %0 = vector.load %arg3[%c0, %c0_0] : memref<8x256xf32, #tpu.memory_space<vmem>>, vector<8x256xf32>
    %1 = arith.mulf %0, %0 : vector<8x256xf32>
    %cst = arith.constant dense<0.000000e+00> : vector<8xf32>
    %2 = vector.multi_reduction <add>, %1, %cst [1] : vector<8x256xf32> to vector<8xf32>
    %3 = vector.shape_cast %2 : vector<8xf32> to vector<8x1xf32>
    %cst_1 = arith.constant 3.906250e-03 : f32
    %4 = vector.broadcast %cst_1 : f32 to vector<8x1xf32>
    %5 = arith.mulf %3, %4 : vector<8x1xf32>
    %c0_2 = arith.constant 0 : index
    %6 = memref.load %arg1[%c0_2] : memref<1xf32, #tpu.memory_space<smem>>
    %7 = math.absf %6 : f32
    %8 = vector.broadcast %7 : f32 to vector<8x1xf32>
    %9 = arith.addf %5, %8 : vector<8x1xf32>
    %10 = math.rsqrt %9 : vector<8x1xf32>
    %c0_3 = arith.constant 0 : index
    %c0_4 = arith.constant 0 : index
    %c0_5 = arith.constant 0 : index
    %11 = vector.load %arg2[%c0_3, %c0_4, %c0_5] : memref<3x8x1xf32, #tpu.memory_space<vmem>>, vector<1x8x1xf32>
    %12 = vector.shape_cast %11 : vector<1x8x1xf32> to vector<8x1xf32>
    %c1 = arith.constant 1 : index
    %c0_6 = arith.constant 0 : index
    %c0_7 = arith.constant 0 : index
    %13 = vector.load %arg2[%c1, %c0_6, %c0_7] : memref<3x8x1xf32, #tpu.memory_space<vmem>>, vector<1x8x1xf32>
    %14 = vector.shape_cast %13 : vector<1x8x1xf32> to vector<8x1xf32>
    %c2 = arith.constant 2 : index
    %c0_8 = arith.constant 0 : index
    %c0_9 = arith.constant 0 : index
    %15 = vector.load %arg2[%c2, %c0_8, %c0_9] : memref<3x8x1xf32, #tpu.memory_space<vmem>>, vector<1x8x1xf32>
    %16 = vector.shape_cast %15 : vector<1x8x1xf32> to vector<8x1xf32>
    %17 = vector.broadcast %10 : vector<8x1xf32> to vector<8x256xf32>
    %18 = arith.mulf %0, %17 : vector<8x256xf32>
    %19 = vector.broadcast %12 : vector<8x1xf32> to vector<8x256xf32>
    %20 = arith.mulf %19, %18 : vector<8x256xf32>
    %21 = vector.broadcast %14 : vector<8x1xf32> to vector<8x256xf32>
    %22 = arith.addf %20, %21 : vector<8x256xf32>
    %23 = vector.broadcast %16 : vector<8x1xf32> to vector<8x256xf32>
    %24 = arith.maximumf %22, %23 : vector<8x256xf32>
    %c0_10 = arith.constant 0 : index
    %c0_11 = arith.constant 0 : index
    %25 = vector.load %arg4[%c0_10, %c0_11] : memref<8x256xf32, #tpu.memory_space<vmem>>, vector<8x256xf32>
    tpu.vector_store %arg4[%c0_10, %c0_11], %24 {strides = array<i32>} : memref<8x256xf32, #tpu.memory_space<vmem>>, vector<8x256xf32>,
    return
  }
  func.func @transform_0(%arg0: i32) -> i32 {
    %c0_i32 = arith.constant 0 : i32
    %c0_i32_0 = arith.constant 0 : i32
    return %c0_i32 : i32
  }
  func.func @transform_1(%arg0: i32) -> (i32, i32, i32) {
    %c0_i32 = arith.constant 0 : i32
    %c0_i32_0 = arith.constant 0 : i32
    %c0_i32_1 = arith.constant 0 : i32
    return %c0_i32, %arg0, %c0_i32_0 : i32, i32, i32
  }
  func.func @transform_2(%arg0: i32) -> (i32, i32) {
    %c0_i32 = arith.constant 0 : i32
    %c0_i32_0 = arith.constant 0 : i32
    return %arg0, %c0_i32 : i32, i32
  }
  func.func @transform_3(%arg0: i32) -> (i32, i32) {
    %c0_i32 = arith.constant 0 : i32
    %c0_i32_0 = arith.constant 0 : i32
    return %arg0, %c0_i32 : i32, i32
  }
}

</mosaic_0001>

<bundles_post_ra>
// kernel: tpu_custom_call.1
= control target key start
LH: loop header
LB: loop body
LE: loop exit
PB: predicated region body
PF: predicated region fallthrough
CT: control target
= control target key end

     0   :  { %v105_v5 = vmov 0   ;;  %s157_s0 = inlined_call_operand.<no memory space> [shape: f32[1], index: 0, kind: input, shape index: {}]   ;;  %s158_s1 = inlined_call_operand.vmem [shape: f32[3,8,1], index: 1, kind: input, shape index: {}]   ;;  %s159_s2 = inlined_call_operand.vmem [shape: f32[8,256], index: 2, kind: input, shape index: {}]   ;;  %s160_s3 = inlined_call_operand.hbm [shape: f32[8,256], index: 3, kind: output, shape index: {}]  }
   0x1   :  { %v16_v0 = vld [vmem:[%s159_s2] sm:$0xff]  ;;  %v17_v1 = vld [vmem:[%s159_s2 + $0x8] sm:$0xff]  ;;  %78 = vset.pattern.permute.xlu1 %v105_v5  ;;  %77 = vset.pattern.permute.xlu0 %v105_v5 }
   0x2   :  { %v73_v2 = vld [vmem:[%s158_s1 + $0x8] sm:$0xff]  ;;  %v18_v3 = vmul.f32 %v16_v0, %v16_v0  ;;  %v19_v4 = vmul.f32 %v17_v1, %v17_v1 }
   0x3   :  { %9 = vsyncpa [#allocation4], 0  ;;  %45 = vperm.xlu1 %78, %v73_v2   ;;  %v74_v7 = vld [vmem:[%s158_s1 + $0x10] sm:$0xff]  ;;  %v29_v8 = vld [vmem:[%s158_s1] sm:$0xff]  ;;  %s25_s23 = sand.u32 2147483647, %s157_s0 }
   0x4   :  { %v20_v6 = vadd.f32 %v19_v4, %v18_v3  ;;  %v26_v9 = vstv %s25_s23  ;;  %s106_s24 = smov [#allocation3]  }
   0x5   :  { %s65_s25 = sshll.u32 %s106_s24, 4  ;;  %s66_s25 = int_to_ptr.vmem [resolvable:$true] %s65_s25 }
   0x6   :  { %21 = vadd.xlane.f32.xlu0 %v20_v6  ;;  %s81_s0 = scalar_lea.vmem %s66_s25, 256  ;;  %p86_p1 = scmp.lt.s32.totalorder %s66_s25, %s66_s25 }
   0x7   :  { %52 = vperm.xlu1 %78, %v74_v7   ;;  %p82_p0 = scmp.ne.s32.totalorder %s66_s25, %s81_s0  ;;  %p87_p2 = scmp.lt.s32.totalorder %s81_s0, %s81_s0 }
   0x9   :  { %p88_p3 = por %p87_p2, %p86_p1 }
   0xb   :  { %p89_p4 = pnand %p88_p3, %p82_p0 }
  0x1c   :  { %38 = vperm.xlu0 %77, %v29_v8  }
  0x82   :  { %v46_v14 = vpop.permute.xlu1 %45 }
  0x86   :  { %v53_v22 = vpop.permute.xlu1 %52 }
  0x93   :  { %v22_v10 = vpop.xlane.xlu0 %21 }
  0x94   :  { %v23_v11 = vmul.f32 0.00390625, %v22_v10 }
  0x96   :  { %v27_v12 = vadd.f32 %v26_v9, %v23_v11 }
  0x98   :  { %79 = vrsqrt.f32 %v27_v12 }
  0x9b   :  { %v39_v15 = vpop.permute.xlu0 %38 }
  0xa2   :  { %v80_v13 = vpop.eup %79 }
  0xa3   :  { %v34_v16 = vmul.f32 %v80_v13, %v16_v0  ;;  %v35_v17 = vmul.f32 %v80_v13, %v17_v1 }
  0xa5   :  { %v41_v18 = vmul.f32 %v39_v15, %v34_v16  ;;  %v42_v19 = vmul.f32 %v39_v15, %v35_v17 }
  0xa7   :  { %v48_v20 = vadd.f32 %v46_v14, %v41_v18  ;;  %v49_v21 = vadd.f32 %v46_v14, %v42_v19 }
  0xa9   :  { %v55_v23 = vmax.f32 %v48_v20, %v53_v22  ;;  %v56_v24 = vmax.f32 %v49_v21, %v53_v22 }
  0xab   :  { %57 = vst [vmem:[#allocation3] sm:$0xff] %v55_v23  ;;  %58 = vst [vmem:[#allocation3 + $0x8] sm:$0xff] %v56_v24 }
  0xac   :  { %92 = shalt.err (!%p89_p4)
}
  0xad   :  { %s93_s27 = scalar_lea.hbm %s160_s3, 256 }
  0xae   :  { %p94_p5 = scmp.ne.s32.totalorder %s160_s3, %s93_s27  ;;  %p97_p6 = scmp.lt.u32.totalorder %s93_s27, %s160_s3 }
  0xb0   :  { %p99_p7 = pnand %p97_p6, %p94_p5 }
  0xb2   :  { %102 = shalt.err (!%p99_p7)
}
  0xb3   :  { %68 = dma.vmem_to_hbm [thread:$0]  %s66_s25, 256, %s160_s3, [#allocation4]  }
  0xb4   :  { %103 = dma.done.wait [#allocation4], 256  }
  0xb5   :  { %104 = vsyncadd [#allocation4], 4294967040 }
  0xb6   :  { %72 = vsyncpa [#allocation4], 1 }

</bundles_post_ra>
